<compile_context>
chip_gen: v5e
topology: v5e:2x2
jax: 0.10.0
libtpu: 0.0.40
codegen_flags: <defaults>
</compile_context>

<pallas_src>
import jax
import jax.numpy as jnp
from jax.experimental import pallas as pl
from jax.experimental.pallas import tpu as pltpu

LANE = 128      # TPU lane width
SUBLANE = 8     # f32 sublane tile


def _round_up(n, m):
    return ((n + m - 1) // m) * m


# ----------------------------------------------------------------------------
# Kernel
# ----------------------------------------------------------------------------
def vae_forward_kernel(
    x_ref, eps_ref,
    w_enc_ref, b_enc_ref,
    w_z_ref, b_z_ref,       # fused [mu_z | log_var_z] head
    w_dec_ref, b_dec_ref,
    w_x_ref, b_x_ref,       # fused [mu_x | log_var_x] head
    z_out_ref,              # (tb, 2*LAT_P)  -> [mu_z | log_var_z]
    x_out_ref,              # (tb, 2*IN_P)   -> [mu_x | log_var_x]
):
    w_enc = w_enc_ref[...]
    cdt = w_enc.dtype                     # matmul compute dtype (f32 or bf16)
    lat_p = eps_ref.shape[-1]             # padded latent width (static)

    # --- shared encoder trunk: Linear + ReLU (f32 accumulation on the MXU) ---
    x = x_ref[...].astype(cdt)
    h = jnp.dot(x, w_enc, preferred_element_type=jnp.float32) + b_enc_ref[...]
    h = jnp.maximum(h, 0.0)

    # --- fused latent heads: one matmul -> [mu_z | log_var_z] ---
    zo = jnp.dot(h.astype(cdt), w_z_ref[...],
                 preferred_element_type=jnp.float32) + b_z_ref[...]
    mu_z = zo[:, :lat_p]
    lv_z = zo[:, lat_p:]

    # --- reparameterization (f32, VPU/EUP): z = eps * exp(0.5*log_var) + mu ---
    z = eps_ref[...] * jnp.exp(0.5 * lv_z) + mu_z

    # --- shared decoder trunk: Linear + ReLU ---
    hd = jnp.dot(z.astype(cdt), w_dec_ref[...],
                 preferred_element_type=jnp.float32) + b_dec_ref[...]
    hd = jnp.maximum(hd, 0.0)

    # --- fused output heads: one matmul -> [mu_x | log_var_x] ---
    xo = jnp.dot(hd.astype(cdt), w_x_ref[...],
                 preferred_element_type=jnp.float32) + b_x_ref[...]

    # Lane-dense concatenated stores; the wrapper splits mu / log_var.
    z_out_ref[...] = zo.astype(z_out_ref.dtype)
    x_out_ref[...] = xo.astype(x_out_ref.dtype)


# ----------------------------------------------------------------------------
# Parameter layout: pad to 128 lanes, fuse head pairs, optional bf16 weights.
# ----------------------------------------------------------------------------
def _prepare_params(p, in_p, hid_p, lat_p, matmul_dtype):
    def pad2(a, rows, cols):
        return jnp.pad(a, ((0, rows - a.shape[0]), (0, cols - a.shape[1])))

    w_enc = pad2(p["w_enc"], in_p, hid_p).astype(matmul_dtype)
    b_enc = pad2(p["b_enc"], 1, hid_p).astype(jnp.float32)

    w_z = jnp.concatenate(
        [pad2(p["w_muz"], hid_p, lat_p), pad2(p["w_lvz"], hid_p, lat_p)],
        axis=1).astype(matmul_dtype)
    b_z = jnp.concatenate(
        [pad2(p["b_muz"], 1, lat_p), pad2(p["b_lvz"], 1, lat_p)],
        axis=1).astype(jnp.float32)

    w_dec = pad2(p["w_dec"], lat_p, hid_p).astype(matmul_dtype)
    b_dec = pad2(p["b_dec"], 1, hid_p).astype(jnp.float32)

    w_x = jnp.concatenate(
        [pad2(p["w_mux"], hid_p, in_p), pad2(p["w_lvx"], hid_p, in_p)],
        axis=1).astype(matmul_dtype)
    b_x = jnp.concatenate(
        [pad2(p["b_mux"], 1, in_p), pad2(p["b_lvx"], 1, in_p)],
        axis=1).astype(jnp.float32)

    return dict(w_enc=w_enc, b_enc=b_enc, w_z=w_z, b_z=b_z,
                w_dec=w_dec, b_dec=b_dec, w_x=w_x, b_x=b_x)


# ----------------------------------------------------------------------------
# Wrapper
# ----------------------------------------------------------------------------
def vae_forward(x, eps, params, *, matmul_dtype=jnp.float32, batch_block=128):
    """Fused VAE forward.

    x:   (B, input_size) float32
    eps: (B, latent_dim) float32   (the torch.randn_like noise, passed in)
    params: dict of (in, out) weights and (1, out) biases (see init_params).
    matmul_dtype: jnp.float32 (exact) or jnp.bfloat16 (v6e/v7x MXU fast path;
                  elementwise math stays f32).
    Returns (mu_x, log_var_x, mu_z, log_var_z) as in the PyTorch module.
    """
    B, input_size = x.shape
    latent_dim = params["w_muz"].shape[1]

    in_p = _round_up(input_size, LANE)
    hid_p = _round_up(params["w_enc"].shape[1], LANE)
    lat_p = _round_up(latent_dim, LANE)

    # Batch tiling: tile of up to `batch_block` rows, padded to a sublane multiple.
    tb = min(batch_block, _round_up(B, SUBLANE))
    b_pad = _round_up(B, tb)
    grid = (b_pad // tb,)

    p = _prepare_params(params, in_p, hid_p, lat_p, matmul_dtype)

    # Zero-pad activations (padded lanes/rows stay exactly zero through the net).
    x_p = jnp.pad(x, ((0, b_pad - B), (0, in_p - input_size)))
    eps_p = jnp.pad(eps, ((0, b_pad - B), (0, lat_p - latent_dim)))

    def row_spec(width):
        return pl.BlockSpec((tb, width), lambda i: (i, 0))

    def resident_spec(a):
        # Constant block index across the (parallel) batch axis -> VMEM-resident.
        return pl.BlockSpec(a.shape, lambda i: (0,) * a.ndim)

    weight_args = (p["w_enc"], p["b_enc"], p["w_z"], p["b_z"],
                   p["w_dec"], p["b_dec"], p["w_x"], p["b_x"])

    in_specs = [row_spec(in_p), row_spec(lat_p)] + [resident_spec(a) for a in weight_args]

    out_shapes = (
        jax.ShapeDtypeStruct((b_pad, 2 * lat_p), jnp.float32),  # [mu_z | log_var_z]
        jax.ShapeDtypeStruct((b_pad, 2 * in_p), jnp.float32),   # [mu_x | log_var_x]
    )
    out_specs = (row_spec(2 * lat_p), row_spec(2 * in_p))

    z_out, x_out = pl.pallas_call(
        vae_forward_kernel,
        out_shape=out_shapes,
        grid=grid,
        in_specs=in_specs,
        out_specs=out_specs,
        compiler_params=pltpu.CompilerParams(
            dimension_semantics=("parallel",)),   # shard batch across TCs (v7x)
    )(x_p, eps_p, *weight_args)

    mu_z = z_out[:B, :latent_dim]
    lv_z = z_out[:B, lat_p:lat_p + latent_dim]
    mu_x = x_out[:B, :input_size]
    lv_x = x_out[:B, in_p:in_p + input_size]
    return mu_x, lv_x, mu_z, lv_z


# ----------------------------------------------------------------------------
# Init + pure-JAX reference
# ----------------------------------------------------------------------------
def init_params(key, input_size, hidden_size, latent_dim):
    """Deterministic parameter init. Weights stored as (in, out)."""
    keys = jax.random.split(key, 12)

    def lin(kw, kb, fan_in, fan_out):
        bound = 1.0 / jnp.sqrt(fan_in)
        w = jax.random.uniform(kw, (fan_in, fan_out), jnp.float32, -bound, bound)
        b = jax.random.uniform(kb, (1, fan_out), jnp.float32, -bound, bound)
        return w, b

    w_enc, b_enc = lin(keys[0], keys[1], input_size, hidden_size)   # shared encoder
    w_muz, b_muz = lin(keys[2], keys[3], hidden_size, latent_dim)
    w_lvz, b_lvz = lin(keys[4], keys[5], hidden_size, latent_dim)
    w_dec, b_dec = lin(keys[6], keys[7], latent_dim, hidden_size)   # shared decoder
    w_mux, b_mux = lin(keys[8], keys[9], hidden_size, input_size)
    w_lvx, b_lvx = lin(keys[10], keys[11], hidden_size, input_size)

    return dict(
        w_enc=w_enc, b_enc=b_enc,
        w_muz=w_muz, b_muz=b_muz,
        w_lvz=w_lvz, b_lvz=b_lvz,
        w_dec=w_dec, b_dec=b_dec,
        w_mux=w_mux, b_mux=b_mux,
        w_lvx=w_lvx, b_lvx=b_lvx,
    )


def vae_forward_ref(x, eps, p):
    """Pure-JAX reference with identical semantics (for correctness check)."""
    h = jnp.maximum(x @ p["w_enc"] + p["b_enc"], 0.0)
    mu_z = h @ p["w_muz"] + p["b_muz"]
    lv_z = h @ p["w_lvz"] + p["b_lvz"]
    z = eps * jnp.exp(0.5 * lv_z) + mu_z
    hd = jnp.maximum(z @ p["w_dec"] + p["b_dec"], 0.0)
    mu_x = hd @ p["w_mux"] + p["b_mux"]
    lv_x = hd @ p["w_lvx"] + p["b_lvx"]
    return mu_x, lv_x, mu_z, lv_z


if __name__ == "__main__":
    batch = 8
    input_size = 32
    hidden_size = 64
    latent_dim = 16

    key = jax.random.PRNGKey(0)
    k_x, k_eps, k_p = jax.random.split(key, 3)

    x = jax.random.normal(k_x, (batch, input_size), jnp.float32)
    # torch.randn_like(std) noise for the reparameterization trick (module RNG
    # is the only part of forward() not reproducible inside the kernel).
    eps = jax.random.normal(k_eps, (batch, latent_dim), jnp.float32)
    params = init_params(k_p, input_size, hidden_size, latent_dim)

    # f32 MXU path: exact parity with the PyTorch/JAX reference.
    mu_x, lv_x, mu_z, lv_z = vae_forward(x, eps, params, matmul_dtype=jnp.float32)
    jax.block_until_ready((mu_x, lv_x, mu_z, lv_z))

    ref = vae_forward_ref(x, eps, params)
    for got, want in zip((mu_x, lv_x, mu_z, lv_z), ref):
        assert got.shape == want.shape
        assert jnp.allclose(got, want, atol=1e-5, rtol=1e-5)

    # bf16-weights MXU fast path (v6e/v7x): f32 accumulation + f32 elementwise.
    outs_bf16 = vae_forward(x, eps, params, matmul_dtype=jnp.bfloat16)
    jax.block_until_ready(outs_bf16)
    for got, want in zip(outs_bf16, ref):
        assert got.shape == want.shape
        assert bool(jnp.all(jnp.isfinite(got)))

    print("KERNEL_OK")
</pallas_src>

<mosaic_0001>
module attributes {stable_mosaic.version = 11 : i64} {
  func.func @vae_forward_kernel(%arg0: i32, %arg1: memref<8x128xf32, #tpu.memory_space<vmem>>, %arg2: memref<8x128xf32, #tpu.memory_space<vmem>>, %arg3: memref<128x128xf32, #tpu.memory_space<vmem>>, %arg4: memref<1x128xf32, #tpu.memory_space<vmem>>, %arg5: memref<128x256xf32, #tpu.memory_space<vmem>>, %arg6: memref<1x256xf32, #tpu.memory_space<vmem>>, %arg7: memref<128x128xf32, #tpu.memory_space<vmem>>, %arg8: memref<1x128xf32, #tpu.memory_space<vmem>>, %arg9: memref<128x256xf32, #tpu.memory_space<vmem>>, %arg10: memref<1x256xf32, #tpu.memory_space<vmem>>, %arg11: memref<8x256xf32, #tpu.memory_space<vmem>>, %arg12: memref<8x256xf32, #tpu.memory_space<vmem>>) attributes {dimension_semantics = [#tpu.dimension_semantics<parallel>], iteration_bounds = array<i64: 1>, scalar_prefetch = 0 : i64, scratch_operands = 0 : i64, tpu.core_type = #tpu.core_type<tc>, window_params = [{transform_indices = @transform_0, window_bounds = array<i64: 8, 128>}, {transform_indices = @transform_1, window_bounds = array<i64: 8, 128>}, {pipeline_mode = #tpu.pipeline_mode<synchronous>, transform_indices = @transform_2, window_bounds = array<i64: 128, 128>}, {pipeline_mode = #tpu.pipeline_mode<synchronous>, transform_indices = @transform_3, window_bounds = array<i64: 1, 128>}, {pipeline_mode = #tpu.pipeline_mode<synchronous>, transform_indices = @transform_4, window_bounds = array<i64: 128, 256>}, {pipeline_mode = #tpu.pipeline_mode<synchronous>, transform_indices = @transform_5, window_bounds = array<i64: 1, 256>}, {pipeline_mode = #tpu.pipeline_mode<synchronous>, transform_indices = @transform_6, window_bounds = array<i64: 128, 128>}, {pipeline_mode = #tpu.pipeline_mode<synchronous>, transform_indices = @transform_7, window_bounds = array<i64: 1, 128>}, {pipeline_mode = #tpu.pipeline_mode<synchronous>, transform_indices = @transform_8, window_bounds = array<i64: 128, 256>}, {pipeline_mode = #tpu.pipeline_mode<synchronous>, transform_indices = @transform_9, window_bounds = array<i64: 1, 256>}, {transform_indices = @transform_10, window_bounds = array<i64: 8, 256>}, {transform_indices = @transform_11, window_bounds = array<i64: 8, 256>}]} {
    %c0 = arith.constant 0 : index
    %c0_0 = arith.constant 0 : index
    %0 = vector.load %arg3[%c0, %c0_0] : memref<128x128xf32, #tpu.memory_space<vmem>>, vector<128x128xf32>
    %c0_1 = arith.constant 0 : index
    %c0_2 = arith.constant 0 : index
    %1 = vector.load %arg1[%c0_1, %c0_2] : memref<8x128xf32, #tpu.memory_space<vmem>>, vector<8x128xf32>
    %cst = arith.constant dense<0.000000e+00> : vector<8x128xf32>
    %2 = tpu.matmul %1, %0, %cst {dimension_numbers = #tpu.dot_dimension_numbers<[1], [0], [0], [1], [0, 0, 1, 1], [], []>} : vector<8x128xf32>, vector<128x128xf32>, vector<8x128xf32> -> vector<8x128xf32>
    %c0_3 = arith.constant 0 : index
    %c0_4 = arith.constant 0 : index
    %3 = vector.load %arg4[%c0_3, %c0_4] : memref<1x128xf32, #tpu.memory_space<vmem>>, vector<1x128xf32>
    %4 = vector.broadcast %3 : vector<1x128xf32> to vector<8x128xf32>
    %5 = arith.addf %2, %4 : vector<8x128xf32>
    %cst_5 = arith.constant 0.000000e+00 : f32
    %6 = vector.broadcast %cst_5 : f32 to vector<8x128xf32>
    %7 = arith.maximumf %5, %6 : vector<8x128xf32>
    %c0_6 = arith.constant 0 : index
    %c0_7 = arith.constant 0 : index
    %8 = vector.load %arg5[%c0_6, %c0_7] : memref<128x256xf32, #tpu.memory_space<vmem>>, vector<128x256xf32>
    %cst_8 = arith.constant dense<0.000000e+00> : vector<8x256xf32>
    %9 = tpu.matmul %7, %8, %cst_8 {dimension_numbers = #tpu.dot_dimension_numbers<[1], [0], [0], [1], [0, 0, 1, 1], [], []>} : vector<8x128xf32>, vector<128x256xf32>, vector<8x256xf32> -> vector<8x256xf32>
    %c0_9 = arith.constant 0 : index
    %c0_10 = arith.constant 0 : index
    %10 = vector.load %arg6[%c0_9, %c0_10] : memref<1x256xf32, #tpu.memory_space<vmem>>, vector<1x256xf32>
    %11 = vector.broadcast %10 : vector<1x256xf32> to vector<8x256xf32>
    %12 = arith.addf %9, %11 : vector<8x256xf32>
    %13 = vector.extract_strided_slice %12 {offsets = [0, 0], sizes = [8, 128], strides = [1, 1]} : vector<8x256xf32> to vector<8x128xf32>
    %14 = vector.extract_strided_slice %12 {offsets = [0, 128], sizes = [8, 128], strides = [1, 1]} : vector<8x256xf32> to vector<8x128xf32>
    %c0_11 = arith.constant 0 : index
    %c0_12 = arith.constant 0 : index
    %15 = vector.load %arg2[%c0_11, %c0_12] : memref<8x128xf32, #tpu.memory_space<vmem>>, vector<8x128xf32>
    %cst_13 = arith.constant 5.000000e-01 : f32
    %16 = vector.broadcast %cst_13 : f32 to vector<8x128xf32>
    %17 = arith.mulf %16, %14 : vector<8x128xf32>
    %18 = math.exp %17 : vector<8x128xf32>
    %19 = arith.mulf %15, %18 : vector<8x128xf32>
    %20 = arith.addf %19, %13 : vector<8x128xf32>
    %c0_14 = arith.constant 0 : index
    %c0_15 = arith.constant 0 : index
    %21 = vector.load %arg7[%c0_14, %c0_15] : memref<128x128xf32, #tpu.memory_space<vmem>>, vector<128x128xf32>
    %cst_16 = arith.constant dense<0.000000e+00> : vector<8x128xf32>
    %22 = tpu.matmul %20, %21, %cst_16 {dimension_numbers = #tpu.dot_dimension_numbers<[1], [0], [0], [1], [0, 0, 1, 1], [], []>} : vector<8x128xf32>, vector<128x128xf32>, vector<8x128xf32> -> vector<8x128xf32>
    %c0_17 = arith.constant 0 : index
    %c0_18 = arith.constant 0 : index
    %23 = vector.load %arg8[%c0_17, %c0_18] : memref<1x128xf32, #tpu.memory_space<vmem>>, vector<1x128xf32>
    %24 = vector.broadcast %23 : vector<1x128xf32> to vector<8x128xf32>
    %25 = arith.addf %22, %24 : vector<8x128xf32>
    %cst_19 = arith.constant 0.000000e+00 : f32
    %26 = vector.broadcast %cst_19 : f32 to vector<8x128xf32>
    %27 = arith.maximumf %25, %26 : vector<8x128xf32>
    %c0_20 = arith.constant 0 : index
    %c0_21 = arith.constant 0 : index
    %28 = vector.load %arg9[%c0_20, %c0_21] : memref<128x256xf32, #tpu.memory_space<vmem>>, vector<128x256xf32>
    %cst_22 = arith.constant dense<0.000000e+00> : vector<8x256xf32>
    %29 = tpu.matmul %27, %28, %cst_22 {dimension_numbers = #tpu.dot_dimension_numbers<[1], [0], [0], [1], [0, 0, 1, 1], [], []>} : vector<8x128xf32>, vector<128x256xf32>, vector<8x256xf32> -> vector<8x256xf32>
    %c0_23 = arith.constant 0 : index
    %c0_24 = arith.constant 0 : index
    %30 = vector.load %arg10[%c0_23, %c0_24] : memref<1x256xf32, #tpu.memory_space<vmem>>, vector<1x256xf32>
    %31 = vector.broadcast %30 : vector<1x256xf32> to vector<8x256xf32>
    %32 = arith.addf %29, %31 : vector<8x256xf32>
    %c0_25 = arith.constant 0 : index
    %c0_26 = arith.constant 0 : index
    %33 = vector.load %arg11[%c0_25, %c0_26] : memref<8x256xf32, #tpu.memory_space<vmem>>, vector<8x256xf32>
    tpu.vector_store %arg11[%c0_25, %c0_26], %12 {strides = array<i32>} : memref<8x256xf32, #tpu.memory_space<vmem>>, vector<8x256xf32>,
    %c0_27 = arith.constant 0 : index
    %c0_28 = arith.constant 0 : index
    %34 = vector.load %arg12[%c0_27, %c0_28] : memref<8x256xf32, #tpu.memory_space<vmem>>, vector<8x256xf32>
    tpu.vector_store %arg12[%c0_27, %c0_28], %32 {strides = array<i32>} : memref<8x256xf32, #tpu.memory_space<vmem>>, vector<8x256xf32>,
    return
  }
  func.func @transform_0(%arg0: i32) -> (i32, i32) {
    %c0_i32 = arith.constant 0 : i32
    %c0_i32_0 = arith.constant 0 : i32
    return %arg0, %c0_i32 : i32, i32
  }
  func.func @transform_1(%arg0: i32) -> (i32, i32) {
    %c0_i32 = arith.constant 0 : i32
    %c0_i32_0 = arith.constant 0 : i32
    return %arg0, %c0_i32 : i32, i32
  }
  func.func @transform_2(%arg0: i32) -> (i32, i32) {
    %c0_i32 = arith.constant 0 : i32
    %c0_i32_0 = arith.constant 0 : i32
    %c0_i32_1 = arith.constant 0 : i32
    return %c0_i32, %c0_i32_0 : i32, i32
  }
  func.func @transform_3(%arg0: i32) -> (i32, i32) {
    %c0_i32 = arith.constant 0 : i32
    %c0_i32_0 = arith.constant 0 : i32
    %c0_i32_1 = arith.constant 0 : i32
    return %c0_i32, %c0_i32_0 : i32, i32
  }
  func.func @transform_4(%arg0: i32) -> (i32, i32) {
    %c0_i32 = arith.constant 0 : i32
    %c0_i32_0 = arith.constant 0 : i32
    %c0_i32_1 = arith.constant 0 : i32
    return %c0_i32, %c0_i32_0 : i32, i32
  }
  func.func @transform_5(%arg0: i32) -> (i32, i32) {
    %c0_i32 = arith.constant 0 : i32
    %c0_i32_0 = arith.constant 0 : i32
    %c0_i32_1 = arith.constant 0 : i32
    return %c0_i32, %c0_i32_0 : i32, i32
  }
  func.func @transform_6(%arg0: i32) -> (i32, i32) {
    %c0_i32 = arith.constant 0 : i32
    %c0_i32_0 = arith.constant 0 : i32
    %c0_i32_1 = arith.constant 0 : i32
    return %c0_i32, %c0_i32_0 : i32, i32
  }
  func.func @transform_7(%arg0: i32) -> (i32, i32) {
    %c0_i32 = arith.constant 0 : i32
    %c0_i32_0 = arith.constant 0 : i32
    %c0_i32_1 = arith.constant 0 : i32
    return %c0_i32, %c0_i32_0 : i32, i32
  }
  func.func @transform_8(%arg0: i32) -> (i32, i32) {
    %c0_i32 = arith.constant 0 : i32
    %c0_i32_0 = arith.constant 0 : i32
    %c0_i32_1 = arith.constant 0 : i32
    return %c0_i32, %c0_i32_0 : i32, i32
  }
  func.func @transform_9(%arg0: i32) -> (i32, i32) {
    %c0_i32 = arith.constant 0 : i32
    %c0_i32_0 = arith.constant 0 : i32
    %c0_i32_1 = arith.constant 0 : i32
    return %c0_i32, %c0_i32_0 : i32, i32
  }
  func.func @transform_10(%arg0: i32) -> (i32, i32) {
    %c0_i32 = arith.constant 0 : i32
    %c0_i32_0 = arith.constant 0 : i32
    return %arg0, %c0_i32 : i32, i32
  }
  func.func @transform_11(%arg0: i32) -> (i32, i32) {
    %c0_i32 = arith.constant 0 : i32
    %c0_i32_0 = arith.constant 0 : i32
    return %arg0, %c0_i32 : i32, i32
  }
}

</mosaic_0001>

<bundles_post_ra>
// kernel: tpu_custom_call.1
= control target key start
LH: loop header
LB: loop body
LE: loop exit
PB: predicated region body
PF: predicated region fallthrough
CT: control target
= control target key end

     0   :  { %17 = vsyncpa [#allocation3], 0  ;;  %s781_s0 = inlined_call_operand.hbm [shape: f32[8,128], index: 0, kind: input, shape index: {}]   ;;  %s782_s1 = inlined_call_operand.hbm [shape: f32[8,128], index: 1, kind: input, shape index: {}]   ;;  %s783_s2 = inlined_call_operand.hbm [shape: f32[128,128], index: 2, kind: input, shape index: {}]   ;;  %s784_s3 = inlined_call_operand.hbm [shape: f32[1,128], index: 3, kind: input, shape index: {}]   ;;  %s785_s4 = inlined_call_operand.hbm [shape: f32[128,256], index: 4, kind: input, shape index: {}]   ;;  %s786_s5 = inlined_call_operand.vmem [shape: f32[1,256], index: 5, kind: input, shape index: {}]   ;;  %s787_s6 = inlined_call_operand.hbm [shape: f32[128,128], index: 6, kind: input, shape index: {}]   ;;  %s788_s7 = inlined_call_operand.vmem [shape: f32[1,128], index: 7, kind: input, shape index: {}]   ;;  %s789_s8 = inlined_call_operand.hbm [shape: f32[128,256], index: 8, kind: input, shape index: {}]   ;;  %s790_s9 = inlined_call_operand.vmem [shape: f32[1,256], index: 9, kind: input, shape index: {}]   ;;  %s791_s10 = inlined_call_operand.hbm [shape: f32[8,256], index: 10, kind: output, shape index: {0}]   ;;  %s792_s11 = inlined_call_operand.hbm [shape: f32[8,256], index: 11, kind: output, shape index: {1}]  }
   0x1   :  { %18 = vsyncpa [#allocation6], 0 }
   0x2   :  { %19 = vsyncpa [#allocation9], 0 }
   0x3   :  { %20 = vsyncpa [#allocation12], 0 }
   0x4   :  { %21 = vsyncpa [#allocation4], 0  ;;  %s39_s19 = sshll.u32 %s782_s1, 4  ;;  %s40_s19 = int_to_ptr.hbm [resolvable:$true] %s39_s19 }
   0x5   :  { %22 = vsyncpa [#allocation16], 0  ;;  %s672_s20 = smov [#allocation5]   ;;  %s63_s24 = sshll.u32 %s784_s3, 4  ;;  %s64_s24 = int_to_ptr.hbm [resolvable:$true] %s63_s24 }
   0x6   :  { %s41_s21 = sshll.u32 %s672_s20, 4  ;;  %s673_s25 = smov [#allocation8]   ;;  %s42_s21 = int_to_ptr.vmem [resolvable:$true] %s41_s21 }
   0x7   :  { %44 = dma.hbm_to_vmem [thread:$0]  %s40_s19, 128, %s42_s21, [#allocation6]  }
   0x8   :  { %s65_s26 = sshll.u32 %s673_s25, 4  ;;  %s88_s29 = sshll.u32 %s787_s6, 4  ;;  %s66_s26 = int_to_ptr.vmem [resolvable:$true] %s65_s26  ;;  %s89_s29 = int_to_ptr.hbm [resolvable:$true] %s88_s29 }
   0x9   :  { %68 = dma.hbm_to_vmem [thread:$0]  %s64_s24, 16, %s66_s26, [#allocation9]  }
   0xa   :  { %s674_s1 = smov [#allocation11]   ;;  %s28_s14 = sshll.u32 %s781_s0, 4  ;;  %s29_s14 = int_to_ptr.hbm [resolvable:$true] %s28_s14 }
   0xb   :  { %s90_s30 = sshll.u32 %s674_s1, 4  ;;  %s675_s15 = smov 128   ;;  %s91_s30 = int_to_ptr.vmem [resolvable:$true] %s90_s30 }
   0xc   :  { %s676_s3 = smov 8   ;;  %s677_s16 = smov [#allocation2]  }
   0xd   :  { %96 = dma.hbm_to_vmem [thread:$0]  %s89_s29, 2048, %s91_s30, [#allocation12], %s675_s15, %s675_s15, %s676_s3  }
   0xe   :  { %s30_s17 = sshll.u32 %s677_s16, 4  ;;  %s49_s20 = sshll.u32 %s783_s2, 4  ;;  %s31_s17 = int_to_ptr.vmem [resolvable:$true] %s30_s17  ;;  %s50_s20 = int_to_ptr.hbm [resolvable:$true] %s49_s20 }
   0xf   :  { %33 = dma.hbm_to_vmem [thread:$0]  %s29_s14, 128, %s31_s17, [#allocation3]  }
  0x10   :  { %s73_s22 = sshll.u32 %s785_s4, 4  ;;  %s678_s23 = smov [#allocation7]   ;;  %s74_s22 = int_to_ptr.hbm [resolvable:$true] %s73_s22 }
  0x11   :  { %s51_s24 = sshll.u32 %s678_s23, 4  ;;  %s679_s0 = smov [#allocation10]   ;;  %s52_s24 = int_to_ptr.vmem [resolvable:$true] %s51_s24 }
  0x12   :  { %57 = dma.hbm_to_vmem [thread:$0]  %s50_s20, 2048, %s52_s24, [#allocation6], %s675_s15, %s675_s15, %s676_s3  }
  0x13   :  { %s75_s25 = sshll.u32 %s679_s0, 4  ;;  %s680_s26 = smov 256   ;;  %s76_s25 = int_to_ptr.vmem [resolvable:$true] %s75_s25 }
  0x14   :  { %s681_s27 = smov 16   ;;  %s103_s29 = sshll.u32 %s789_s8, 4  ;;  %s104_s29 = int_to_ptr.hbm [resolvable:$true] %s103_s29 }
  0x15   :  { %81 = dma.hbm_to_vmem [thread:$0]  %s74_s22, 4096, %s76_s25, [#allocation9], %s680_s26, %s680_s26, %s681_s27  }
  0x16   :  { %s682_s1 = smov [#allocation13]  }
  0x17   :  { %s105_s30 = sshll.u32 %s682_s1, 4  ;;  %s106_s30 = int_to_ptr.vmem [resolvable:$true] %s105_s30 }
  0x18   :  { %111 = dma.hbm_to_vmem [thread:$0]  %s104_s29, 4096, %s106_s30, [#allocation12], %s680_s26, %s680_s26, %s681_s27  }
  0x19   :  { %660 = dma.done.wait [#allocation3], 128  }
  0x1a   :  { %661 = vsyncadd [#allocation3], 4294967168 }
  0x1b   :  { %662 = dma.done.wait [#allocation6], 2176  }
  0x1c   :  { %663 = vsyncadd [#allocation6], 4294965120 }
  0x1d   :  { %664 = dma.done.wait [#allocation9], 4112  }
  0x1e   :  { %665 = vsyncadd [#allocation9], 4294963184 }
  0x1f   :  { %666 = dma.done.wait [#allocation12], 6144  }
  0x20   :  { %667 = vsyncadd [#allocation12], 4294961152  ;;  %v157_v0 = vld [vmem:[#allocation7 + $0x78] sm:$0xff]  ;;  %v156_v1 = vld [vmem:[#allocation7 + $0x70] sm:$0xff]  ;;  %s683_s13 = smov [#allocation14]   ;;  %s398_s16 = sshll.u32 %s791_s10, 4  ;;  %s399_s16 = int_to_ptr.hbm [resolvable:$true] %s398_s16 }
  0x21   :  { %163 = vmatpush.msra.mxu0 %v157_v0  ;;  %v155_v2 = vld [vmem:[#allocation7 + $0x68] sm:$0xff]  ;;  %v154_v3 = vld [vmem:[#allocation7 + $0x60] sm:$0xff]  ;;  %v153_v4 = vld [vmem:[#allocation7 + $0x58] sm:$0xff]  ;;  %s396_s14 = sshll.u32 %s683_s13, 4  ;;  %s409_s21 = sshll.u32 %s792_s11, 4  ;;  %s397_s14 = int_to_ptr.vmem [resolvable:$true] %s396_s14  ;;  %s410_s21 = int_to_ptr.hbm [resolvable:$true] %s409_s21 }
  0x22   :  { %v214_v5 = vld [vmem:[#allocation10 + $0xf0] sm:$0xff]  ;;  %v215_v6 = vld [vmem:[#allocation10 + $0xf8] sm:$0xff]  ;;  %v212_v7 = vld [vmem:[#allocation10 + $0xe0] sm:$0xff] }
  0x23   :  { %164 = vmatpush.msra.mxu0 %v156_v1  ;;  %222 = vmatpush.msra.mxu1 %v214_v5  ;;  %v213_v8 = vld [vmem:[#allocation10 + $0xe8] sm:$0xff]  ;;  %v210_v9 = vld [vmem:[#allocation10 + $0xd0] sm:$0xff]  ;;  %v211_v11 = vld [vmem:[#allocation10 + $0xd8] sm:$0xff] }
  0x24   :  { %242 = vmatpush.msra.mxu2 %v215_v6  ;;  %v152_v10 = vld [vmem:[#allocation7 + $0x50] sm:$0xff]  ;;  %v208_v12 = vld [vmem:[#allocation10 + $0xc0] sm:$0xff]  ;;  %v207_v17 = vld [vmem:[#allocation10 + $0xb8] sm:$0xff] }
  0x25   :  { %165 = vmatpush.msra.mxu0 %v155_v2  ;;  %223 = vmatpush.msra.mxu1 %v212_v7  ;;  %v151_v13 = vld [vmem:[#allocation7 + $0x48] sm:$0xff]  ;;  %v206_v15 = vld [vmem:[#allocation10 + $0xb0] sm:$0xff]  ;;  %v150_v16 = vld [vmem:[#allocation7 + $0x40] sm:$0xff] }
  0x26   :  { %243 = vmatpush.msra.mxu2 %v213_v8  ;;  %v209_v14 = vld [vmem:[#allocation10 + $0xc8] sm:$0xff]  ;;  %v204_v18 = vld [vmem:[#allocation10 + $0xa0] sm:$0xff]  ;;  %v149_v19 = vld [vmem:[#allocation7 + $0x38] sm:$0xff] }
  0x27   :  { %166 = vmatpush.msra.mxu0 %v154_v3  ;;  %224 = vmatpush.msra.mxu1 %v210_v9  ;;  %v205_v20 = vld [vmem:[#allocation10 + $0xa8] sm:$0xff]  ;;  %v202_v21 = vld [vmem:[#allocation10 + $0x90] sm:$0xff]  ;;  %v203_v23 = vld [vmem:[#allocation10 + $0x98] sm:$0xff] }
  0x28   :  { %244 = vmatpush.msra.mxu2 %v211_v11  ;;  %v148_v22 = vld [vmem:[#allocation7 + $0x30] sm:$0xff]  ;;  %v200_v24 = vld [vmem:[#allocation10 + $0x80] sm:$0xff]  ;;  %v199_v29 = vld [vmem:[#allocation10 + $0x78] sm:$0xff] }
  0x29   :  { %167 = vmatpush.msra.mxu0 %v153_v4  ;;  %225 = vmatpush.msra.mxu1 %v208_v12  ;;  %v147_v25 = vld [vmem:[#allocation7 + $0x28] sm:$0xff]  ;;  %v198_v27 = vld [vmem:[#allocation10 + $0x70] sm:$0xff]  ;;  %v146_v28 = vld [vmem:[#allocation7 + $0x20] sm:$0xff] }
  0x2a   :  { %245 = vmatpush.msra.mxu2 %v209_v14  ;;  %v201_v26 = vld [vmem:[#allocation10 + $0x88] sm:$0xff]  ;;  %v196_v30 = vld [vmem:[#allocation10 + $0x60] sm:$0xff]  ;;  %v145_v31 = vld [vmem:[#allocation7 + $0x18] sm:$0xff] }
  0x2b   :  { %168 = vmatpush.msra.mxu0 %v152_v10  ;;  %226 = vmatpush.msra.mxu1 %v206_v15  ;;  %v197_v32 = vld [vmem:[#allocation10 + $0x68] sm:$0xff]  ;;  %v194_v33 = vld [vmem:[#allocation10 + $0x50] sm:$0xff]  ;;  %v195_v35 = vld [vmem:[#allocation10 + $0x58] sm:$0xff] }
  0x2c   :  { %246 = vmatpush.msra.mxu2 %v207_v17  ;;  %v144_v34 = vld [vmem:[#allocation7 + $0x10] sm:$0xff]  ;;  %v192_v36 = vld [vmem:[#allocation10 + $0x40] sm:$0xff]  ;;  %v191_v41 = vld [vmem:[#allocation10 + $0x38] sm:$0xff] }
  0x2d   :  { %169 = vmatpush.msra.mxu0 %v151_v13  ;;  %227 = vmatpush.msra.mxu1 %v204_v18  ;;  %v143_v37 = vld [vmem:[#allocation7 + $0x8] sm:$0xff]  ;;  %v190_v39 = vld [vmem:[#allocation10 + $0x30] sm:$0xff]  ;;  %v142_v40 = vld [vmem:[#allocation7] sm:$0xff] }
  0x2e   :  { %247 = vmatpush.msra.mxu2 %v205_v20  ;;  %v193_v38 = vld [vmem:[#allocation10 + $0x48] sm:$0xff]  ;;  %v188_v43 = vld [vmem:[#allocation10 + $0x20] sm:$0xff]  ;;  %v186_v45 = vld [vmem:[#allocation10 + $0x10] sm:$0xff] }
  0x2f   :  { %170 = vmatpush.msra.mxu0 %v150_v16  ;;  %228 = vmatpush.msra.mxu1 %v202_v21  ;;  %v158_v42 = vld [vmem:[#allocation2] sm:$0xff]  ;;  %v187_v46 = vld [vmem:[#allocation10 + $0x18] sm:$0xff]  ;;  %v184_v47 = vld [vmem:[#allocation10] sm:$0xff] }
  0x30   :  { %248 = vmatpush.msra.mxu2 %v203_v23  ;;  %v189_v44 = vld [vmem:[#allocation10 + $0x28] sm:$0xff]  ;;  %v283_v49 = vld [vmem:[#allocation11 + $0x78] sm:$0xff]  ;;  %v282_v50 = vld [vmem:[#allocation11 + $0x70] sm:$0xff] }
  0x31   :  { %171 = vmatpush.msra.mxu0 %v149_v19  ;;  %229 = vmatpush.msra.mxu1 %v200_v24  ;;  %v185_v48 = vld [vmem:[#allocation10 + $0x8] sm:$0xff]  ;;  %v280_v52 = vld [vmem:[#allocation11 + $0x60] sm:$0xff]  ;;  %v440_v53 = vld [vmem:[#allocation8] ss:$0 sm:$0xff] }
  0x32   :  { %249 = vmatpush.msra.mxu2 %v201_v26  ;;  %288 = vmatpush.msra.mxu3 %v283_v49  ;;  %v281_v51 = vld [vmem:[#allocation11 + $0x68] sm:$0xff]  ;;  %v279_v57 = vld [vmem:[#allocation11 + $0x58] sm:$0xff]  ;;  %v278_v58 = vld [vmem:[#allocation11 + $0x50] sm:$0xff] }
  0x33   :  { %172 = vmatpush.msra.mxu0 %v148_v22  ;;  %230 = vmatpush.msra.mxu1 %v198_v27  ;;  %v277_v59 = vld [vmem:[#allocation11 + $0x48] sm:$0xff]  ;;  %v276_v60 = vld [vmem:[#allocation11 + $0x40] sm:$0xff]  ;;  %v275_v61 = vld [vmem:[#allocation11 + $0x38] sm:$0xff] }
  0x34   :  { %250 = vmatpush.msra.mxu2 %v199_v29  ;;  %289 = vmatpush.msra.mxu3 %v282_v50  ;;  %v274_v62 = vld [vmem:[#allocation11 + $0x30] sm:$0xff]  ;;  %v273_v63 = vld [vmem:[#allocation11 + $0x28] sm:$0xff]  ;;  %v272_v0 = vld [vmem:[#allocation11 + $0x20] sm:$0xff] }
  0x35   :  { %173 = vmatpush.msra.mxu0 %v147_v25  ;;  %231 = vmatpush.msra.mxu1 %v196_v30  ;;  %v271_v1 = vld [vmem:[#allocation11 + $0x18] sm:$0xff]  ;;  %v270_v2 = vld [vmem:[#allocation11 + $0x10] sm:$0xff]  ;;  %v269_v3 = vld [vmem:[#allocation11 + $0x8] sm:$0xff] }
  0x36   :  { %251 = vmatpush.msra.mxu2 %v197_v32  ;;  %290 = vmatpush.msra.mxu3 %v281_v51  ;;  %v268_v4 = vld [vmem:[#allocation11] sm:$0xff]  ;;  %v339_v5 = vld [vmem:[#allocation13 + $0xf0] sm:$0xff]  ;;  %v340_v6 = vld [vmem:[#allocation13 + $0xf8] sm:$0xff] }
  0x37   :  { %174 = vmatpush.msra.mxu0 %v146_v28  ;;  %232 = vmatpush.msra.mxu1 %v194_v33  ;;  %v337_v7 = vld [vmem:[#allocation13 + $0xe0] sm:$0xff]  ;;  %v338_v8 = vld [vmem:[#allocation13 + $0xe8] sm:$0xff]  ;;  %v335_v10 = vld [vmem:[#allocation13 + $0xd0] sm:$0xff] }
  0x38   :  { %252 = vmatpush.msra.mxu2 %v195_v35  ;;  %291 = vmatpush.msra.mxu3 %v280_v52  ;;  %v216_v9 = vld [vmem:[%s786_s5] sm:$0x3]  ;;  %v336_v11 = vld [vmem:[#allocation13 + $0xd8] sm:$0xff]  ;;  %v333_v12 = vld [vmem:[#allocation13 + $0xc0] sm:$0xff] }
  0x39   :  { %175 = vmatpush.msra.mxu0 %v145_v31  ;;  %233 = vmatpush.msra.mxu1 %v192_v36  ;;  %v334_v13 = vld [vmem:[#allocation13 + $0xc8] sm:$0xff]  ;;  %v218_v14 = vperm.slane %v216_v9, 0  ;;  %v331_v15 = vld [vmem:[#allocation13 + $0xb0] sm:$0xff]  ;;  %v332_v16 = vld [vmem:[#allocation13 + $0xb8] sm:$0xff]  ;;  %v219_v23 = vperm.slane %v216_v9, 1 }
  0x3a   :  { %253 = vmatpush.msra.mxu2 %v193_v38  ;;  %292 = vmatpush.msra.mxu3 %v279_v57  ;;  %v329_v18 = vld [vmem:[#allocation13 + $0xa0] sm:$0xff]  ;;  %v330_v19 = vld [vmem:[#allocation13 + $0xa8] sm:$0xff]  ;;  %v327_v21 = vld [vmem:[#allocation13 + $0x90] sm:$0xff] }
  0x3b   :  { %176 = vmatpush.msra.mxu0 %v144_v34  ;;  %234 = vmatpush.msra.mxu1 %v190_v39  ;;  %v328_v22 = vld [vmem:[#allocation13 + $0x98] sm:$0xff]  ;;  %v325_v24 = vld [vmem:[#allocation13 + $0x80] sm:$0xff]  ;;  %v326_v25 = vld [vmem:[#allocation13 + $0x88] sm:$0xff] }
  0x3c   :  { %254 = vmatpush.msra.mxu2 %v191_v41  ;;  %293 = vmatpush.msra.mxu3 %v278_v58  ;;  %v323_v27 = vld [vmem:[#allocation13 + $0x70] sm:$0xff]  ;;  %v324_v28 = vld [vmem:[#allocation13 + $0x78] sm:$0xff]  ;;  %v321_v30 = vld [vmem:[#allocation13 + $0x60] sm:$0xff] }
  0x3d   :  { %177 = vmatpush.msra.mxu0 %v143_v37  ;;  %235 = vmatpush.msra.mxu1 %v188_v43  ;;  %v322_v31 = vld [vmem:[#allocation13 + $0x68] sm:$0xff]  ;;  %v319_v33 = vld [vmem:[#allocation13 + $0x50] sm:$0xff]  ;;  %v320_v34 = vld [vmem:[#allocation13 + $0x58] sm:$0xff] }
  0x3e   :  { %255 = vmatpush.msra.mxu2 %v189_v44  ;;  %294 = vmatpush.msra.mxu3 %v277_v59  ;;  %v317_v36 = vld [vmem:[#allocation13 + $0x40] sm:$0xff]  ;;  %v318_v37 = vld [vmem:[#allocation13 + $0x48] sm:$0xff]  ;;  %v315_v38 = vld [vmem:[#allocation13 + $0x30] sm:$0xff] }
  0x3f   :  { %178 = vmatpush.msra.mxu0 %v142_v40  ;;  %236 = vmatpush.msra.mxu1 %v186_v45  ;;  %v316_v39 = vld [vmem:[#allocation13 + $0x38] sm:$0xff]  ;;  %v313_v44 = vld [vmem:[#allocation13 + $0x20] sm:$0xff]  ;;  %v314_v45 = vld [vmem:[#allocation13 + $0x28] sm:$0xff] }
  0x40   :  { %179 = vmatmul.f32.vlgmr.msra.gmra.mxu0 %v158_v42  ;;  %256 = vmatpush.msra.mxu2 %v187_v46  ;;  %v262_v40 = vld [vmem:[#allocation5] sm:$0xff]  ;;  %v310_v49 = vld [vmem:[#allocation13 + $0x8] sm:$0xff] }
  0x41   :  { %237 = vmatpush.msra.mxu1 %v184_v47  ;;  %295 = vmatpush.msra.mxu3 %v276_v60  ;;  %v311_v46 = vld [vmem:[#allocation13 + $0x10] sm:$0xff]  ;;  %v312_v47 = vld [vmem:[#allocation13 + $0x18] sm:$0xff]  ;;  %v441_v50 = vld [vmem:[%s788_s7] ss:$0 sm:$0xff]  ;;  %s684_s7 = smov [#allocation15]  }
  0x42   :  { %257 = vmatpush.msra.mxu2 %v185_v48  ;;  %347 = vmatpush.msrb.mxu0 %v339_v5  ;;  %v309_v48 = vld [vmem:[#allocation13] sm:$0xff]  ;;  %s407_s19 = sshll.u32 %s684_s7, 4  ;;  %s408_s19 = int_to_ptr.vmem [resolvable:$true] %s407_s19 }
  0x43   :  { %296 = vmatpush.msra.mxu3 %v275_v61  ;;  %367 = vmatpush.msrb.mxu1 %v340_v6 }
  0x44   :  { %348 = vmatpush.msrb.mxu0 %v337_v7 }
  0x45   :  { %297 = vmatpush.msra.mxu3 %v274_v62  ;;  %368 = vmatpush.msrb.mxu1 %v338_v8 }
  0x46   :  { %349 = vmatpush.msrb.mxu0 %v335_v10 }
  0x47   :  { %298 = vmatpush.msra.mxu3 %v273_v63  ;;  %369 = vmatpush.msrb.mxu1 %v336_v11 }
  0x48   :  { %350 = vmatpush.msrb.mxu0 %v333_v12 }
  0x49   :  { %299 = vmatpush.msra.mxu3 %v272_v0  ;;  %370 = vmatpush.msrb.mxu1 %v334_v13 }
  0x4a   :  { %351 = vmatpush.msrb.mxu0 %v331_v15 }
  0x4b   :  { %300 = vmatpush.msra.mxu3 %v271_v1  ;;  %371 = vmatpush.msrb.mxu1 %v332_v16 }
  0x4c   :  { %352 = vmatpush.msrb.mxu0 %v329_v18 }
  0x4d   :  { %301 = vmatpush.msra.mxu3 %v270_v2  ;;  %372 = vmatpush.msrb.mxu1 %v330_v19 }
  0x4e   :  { %353 = vmatpush.msrb.mxu0 %v327_v21 }
  0x4f   :  { %302 = vmatpush.msra.mxu3 %v269_v3  ;;  %373 = vmatpush.msrb.mxu1 %v328_v22 }
  0x50   :  { %354 = vmatpush.msrb.mxu0 %v325_v24 }
  0x51   :  { %303 = vmatpush.msra.mxu3 %v268_v4  ;;  %374 = vmatpush.msrb.mxu1 %v326_v25 }
  0x52   :  { %355 = vmatpush.msrb.mxu0 %v323_v27 }
  0x53   :  { %375 = vmatpush.msrb.mxu1 %v324_v28 }
  0x54   :  { %356 = vmatpush.msrb.mxu0 %v321_v30 }
  0x55   :  { %376 = vmatpush.msrb.mxu1 %v322_v31 }
  0x56   :  { %357 = vmatpush.msrb.mxu0 %v319_v33 }
  0x57   :  { %377 = vmatpush.msrb.mxu1 %v320_v34 }
  0x58   :  { %358 = vmatpush.msrb.mxu0 %v317_v36 }
  0x59   :  { %378 = vmatpush.msrb.mxu1 %v318_v37 }
  0x5a   :  { %359 = vmatpush.msrb.mxu0 %v315_v38 }
  0x5b   :  { %379 = vmatpush.msrb.mxu1 %v316_v39 }
  0x5c   :  { %360 = vmatpush.msrb.mxu0 %v313_v44 }
  0x5d   :  { %380 = vmatpush.msrb.mxu1 %v314_v45 }
  0x5e   :  { %361 = vmatpush.msrb.mxu0 %v311_v46 }
  0x5f   :  { %381 = vmatpush.msrb.mxu1 %v312_v47 }
  0x60   :  { %362 = vmatpush.msrb.mxu0 %v309_v48 }
  0x61   :  { %382 = vmatpush.msrb.mxu1 %v310_v49 }
  0xbd   :  { %v180_v54 = vpop.f32.mrf.mxu0 }
  0xbe   :  { %v181_v55 = vadd.f32 %v440_v53, %v180_v54  ;;  %v341_v54 = vld [vmem:[%s790_s9] sm:$0x3] }
  0xc0   :  { %v183_v56 = vmax.f32 %v181_v55, 0.0  ;;  %v343_v55 = vperm.slane %v341_v54, 0 }
  0xc2   :  { %238 = vmatmul.f32.vlgmr.msra.gmra.mxu1 %v183_v56  ;;  %258 = vmatmul.f32.vlgmr.msra.gmra.mxu2 %v183_v56  ;;  %v344_v56 = vperm.slane %v341_v54, 1 }
 0x13f   :  { %v239_v17 = vpop.f32.mrf.mxu1 }
 0x140   :  { %v240_v20 = vadd.f32 %v239_v17, %v218_v14 }
 0x142   :  { %387 = vst [vmem:[#allocation14] sm:$0xff] %v240_v20 }
 0x145   :  { %v259_v26 = vpop.f32.mrf.mxu2 }
 0x146   :  { %v260_v29 = vadd.f32 %v259_v26, %v219_v23 }
 0x148   :  { %v263_v32 = vmul.f32 0.5, %v260_v29  ;;  %388 = vst [vmem:[#allocation14 + $0x8] sm:$0xff] %v260_v29 }
 0x149   :  { %401 = dma.vmem_to_hbm [thread:$0]  %s397_s14, 256, %s399_s16, [#allocation4]  }
 0x14a   :  { %v264_v35 = vmul.f32 1.442695, %v263_v32 }
 0x14c   :  { %442 = vpow2.f32 %v264_v35 }
 0x152   :  { %v443_v41 = vpop.eup %442 }
 0x153   :  { %v266_v42 = vmul.f32 %v443_v41, %v262_v40 }
 0x155   :  { %v267_v43 = vadd.f32 %v266_v42, %v240_v20 }
 0x157   :  { %304 = vmatmul.f32.vlgmr.msra.gmra.mxu3 %v267_v43 }
 0x1da   :  { %v305_v51 = vpop.f32.mrf.mxu3 }
 0x1db   :  { %v306_v52 = vadd.f32 %v441_v50, %v305_v51 }
 0x1dd   :  { %v308_v53 = vmax.f32 %v306_v52, 0.0 }
 0x1df   :  { %363 = vmatmul.f32.vlgmr.msrb.gmra.mxu0 %v308_v53  ;;  %383 = vmatmul.f32.vlgmr.msrb.gmra.mxu1 %v308_v53 }
 0x25c   :  { %v364_v57 = vpop.f32.mrf.mxu0  ;;  %v384_v58 = vpop.f32.mrf.mxu1 }
 0x25d   :  { %v365_v59 = vadd.f32 %v364_v57, %v343_v55  ;;  %v385_v60 = vadd.f32 %v384_v58, %v344_v56 }
 0x25f   :  { %389 = vst [vmem:[#allocation15] sm:$0xff] %v365_v59 }
 0x260   :  { %390 = vst [vmem:[#allocation15 + $0x8] sm:$0xff] %v385_v60 }
 0x261   :  { %412 = dma.vmem_to_hbm [thread:$0]  %s408_s19, 256, %s410_s21, [#allocation16]  }
 0x262   :  { %668 = dma.done.wait [#allocation4], 256  }
 0x263   :  { %669 = vsyncadd [#allocation4], 4294967040 }
 0x264   :  { %670 = dma.done.wait [#allocation16], 256  }
 0x265   :  { %671 = vsyncadd [#allocation16], 4294967040 }
 0x266   :  { %421 = vsyncpa [#allocation3], 1 }
 0x267   :  { %422 = vsyncpa [#allocation6], 1 }
 0x268   :  { %423 = vsyncpa [#allocation9], 1 }
 0x269   :  { %424 = vsyncpa [#allocation12], 1 }
 0x26a   :  { %425 = vsyncpa [#allocation4], 1 }
 0x26b   :  { %426 = vsyncpa [#allocation16], 1 }

</bundles_post_ra>
